<compile_context>
chip_gen: v6e
topology: v6e:2x2x1
jax: 0.10.0
libtpu: 0.0.40
codegen_flags: <defaults>
</compile_context>

<pallas_src>
import functools

import jax
import jax.numpy as jnp
import numpy as np
from jax.experimental import pallas as pl
from jax.experimental.pallas import tpu as pltpu


def _round_up(x: int, m: int) -> int:
    return ((x + m - 1) // m) * m


def _fused_forward_kernel(x_ref, wb_ref, bb_ref, cal_ref, b_ref, o_ref,
                          acc_ref, *, vector_scaling: bool):
    """Grid = (batch tiles i, contraction tiles k); k is the reduction axis."""
    k = pl.program_id(1)

    @pl.when(k == 0)
    def _():
        acc_ref[...] = jnp.zeros_like(acc_ref)

    # Backbone partial matmul for this K tile (MXU, f32 accumulation).
    acc_ref[...] += jnp.dot(x_ref[...], wb_ref[...],
                            preferred_element_type=jnp.float32)

    @pl.when(k == pl.num_programs(1) - 1)
    def _():
        # Finalize: backbone bias once, then the calibration linear layer.
        logits = acc_ref[...] + bb_ref[...]                      # (tm, Cp)
        if vector_scaling:
            out = logits * cal_ref[...] + b_ref[...]             # diag passed as (1, Cp)
        else:
            out = jnp.dot(logits, cal_ref[...],
                          preferred_element_type=jnp.float32) + b_ref[...]
        o_ref[...] = out.astype(o_ref.dtype)


def matrix_and_vector_scaling_forward(x_nchw, backbone_w, backbone_b,
                                      weights, bias, *,
                                      vector_scaling: bool = False,
                                      matmul_dtype=jnp.float32,
                                      tm_max: int = 256,
                                      tk_max: int = 512):
    """Fused forward: backbone (flatten + dense) + calibration linear."""
    n = x_nchw.shape[0]
    f = int(np.prod(x_nchw.shape[1:]))
    num_classes = weights.shape[0]

    # ---- tile plan (lane / sublane friendly) -------------------------------
    sub = 16                                   # covers bf16 (16) and f32 (8)
    tm = min(tm_max, _round_up(n, sub))        # batch tile
    n_pad = _round_up(n, tm)
    tk = min(tk_max, _round_up(f, 128))        # contraction tile
    f_pad = _round_up(f, tk)
    c_pad = _round_up(num_classes, 128)        # lane-dense class dimension

    # ---- pad & cast operands in the wrapper (zero padding is exact) -------
    x_flat = x_nchw.reshape(n, f)
    x_p = jnp.pad(x_flat.astype(matmul_dtype),
                  ((0, n_pad - n), (0, f_pad - f)))
    wb_p = jnp.pad(backbone_w.astype(matmul_dtype),
                   ((0, f_pad - f), (0, c_pad - num_classes)))
    bb_p = jnp.pad(backbone_b.astype(jnp.float32),
                   (0, c_pad - num_classes)).reshape(1, c_pad)
    b_p = jnp.pad(bias.astype(jnp.float32),
                  (0, c_pad - num_classes)).reshape(1, c_pad)

    if vector_scaling:
        # diag(W) extracted host/wrapper-side: no C x C DMA or XLU reduce.
        cal = jnp.pad(jnp.diagonal(weights).astype(jnp.float32),
                      (0, c_pad - num_classes)).reshape(1, c_pad)
        cal_spec = pl.BlockSpec((1, c_pad), lambda i, k: (0, 0))
    else:
        cal = jnp.pad(weights.astype(jnp.float32),
                      ((0, c_pad - num_classes), (0, c_pad - num_classes)))
        cal_spec = pl.BlockSpec((c_pad, c_pad), lambda i, k: (0, 0))

    grid = (n_pad // tm, f_pad // tk)

    flops = 2 * n_pad * f_pad * c_pad
    if not vector_scaling:
        flops += 2 * n_pad * c_pad * c_pad
    bytes_accessed = (x_p.size * x_p.dtype.itemsize
                      + wb_p.size * wb_p.dtype.itemsize
                      + bb_p.size * 4 + b_p.size * 4 + cal.size * 4
                      + n_pad * c_pad * 4)
    cost = pl.CostEstimate(flops=flops, transcendentals=0,
                           bytes_accessed=bytes_accessed)

    kernel = functools.partial(_fused_forward_kernel,
                               vector_scaling=vector_scaling)

    out_padded = pl.pallas_call(
        kernel,
        out_shape=jax.ShapeDtypeStruct((n_pad, c_pad), jnp.float32),
        grid_spec=pltpu.PrefetchScalarGridSpec(
            num_scalar_prefetch=0,
            grid=grid,
            in_specs=[
                pl.BlockSpec((tm, tk), lambda i, k: (i, k)),      # x tile
                pl.BlockSpec((tk, c_pad), lambda i, k: (k, 0)),   # backbone W tile
                pl.BlockSpec((1, c_pad), lambda i, k: (0, 0)),    # backbone bias
                cal_spec,                                         # calibration W / diag
                pl.BlockSpec((1, c_pad), lambda i, k: (0, 0)),    # calibration bias
            ],
            out_specs=pl.BlockSpec((tm, c_pad), lambda i, k: (i, 0)),
            scratch_shapes=[pltpu.VMEM((tm, c_pad), jnp.float32)],
        ),
        compiler_params=pltpu.CompilerParams(
            dimension_semantics=("parallel", "arbitrary")),
        cost_estimate=cost,
    )(x_p, wb_p, bb_p, cal, b_p)

    return out_padded[:n, :num_classes]


def _reference_forward(x_nchw, backbone_w, backbone_b, weights, bias,
                       *, vector_scaling=False):
    n = x_nchw.shape[0]
    logits = x_nchw.reshape(n, -1) @ backbone_w + backbone_b[None, :]
    if vector_scaling:
        return logits * jnp.diag(weights)[None, :] + bias[None, :]
    return logits @ weights + bias[None, :]


if __name__ == "__main__":
    key = jax.random.PRNGKey(0)
    k_x, k_w, k_b, k_cw = jax.random.split(key, 4)

    N, C, H, W = 2, 4, 16, 16          # input: [2, 4, 16, 16] (NCHW)
    num_classes = 8
    F = C * H * W

    x = jax.random.normal(k_x, (N, C, H, W), dtype=jnp.float32)

    # Deterministic stand-in backbone (the module deepcopies an arbitrary
    # `model`; we use flatten + dense here).
    # TODO(synk): arbitrary wrapped `self.model` has no generic Pallas
    # equivalent; a dense backbone is substituted.
    backbone_w = 0.02 * jax.random.normal(k_w, (F, num_classes), dtype=jnp.float32)
    backbone_b = 0.1 * jax.random.normal(k_b, (num_classes,), dtype=jnp.float32)

    # Calibration parameters, initialized like the module's __init__
    # (ones / zeros), then perturbed slightly so both branches are non-trivial.
    weights = jnp.ones((num_classes, num_classes), dtype=jnp.float32) \
        + 0.05 * jax.random.normal(k_cw, (num_classes, num_classes), dtype=jnp.float32)
    bias = jnp.zeros((num_classes,), dtype=jnp.float32) + 0.01

    # ---- Matrix scaling branch (f32 path, tight tolerance) ----------------
    out_mat = matrix_and_vector_scaling_forward(
        x, backbone_w, backbone_b, weights, bias, vector_scaling=False)
    jax.block_until_ready(out_mat)
    ref_mat = _reference_forward(
        x, backbone_w, backbone_b, weights, bias, vector_scaling=False)
    np.testing.assert_allclose(np.asarray(out_mat), np.asarray(ref_mat),
                               rtol=1e-5, atol=1e-5)

    # ---- Vector scaling branch (f32 path, tight tolerance) ----------------
    out_vec = matrix_and_vector_scaling_forward(
        x, backbone_w, backbone_b, weights, bias, vector_scaling=True)
    jax.block_until_ready(out_vec)
    ref_vec = _reference_forward(
        x, backbone_w, backbone_b, weights, bias, vector_scaling=True)
    np.testing.assert_allclose(np.asarray(out_vec), np.asarray(ref_vec),
                               rtol=1e-5, atol=1e-5)

    # ---- bf16 backbone-matmul path (fast MXU path; looser tolerance) ------
    out_bf16 = matrix_and_vector_scaling_forward(
        x, backbone_w, backbone_b, weights, bias, vector_scaling=False,
        matmul_dtype=jnp.bfloat16)
    jax.block_until_ready(out_bf16)
    np.testing.assert_allclose(np.asarray(out_bf16), np.asarray(ref_mat),
                               rtol=5e-2, atol=5e-2)

    print("KERNEL_OK")
</pallas_src>

<mosaic_0001>
module attributes {stable_mosaic.version = 11 : i64} {
  func.func @_fused_forward_kernel(%arg0: i32, %arg1: i32, %arg2: memref<16x512xf32, #tpu.memory_space<vmem>>, %arg3: memref<512x128xf32, #tpu.memory_space<vmem>>, %arg4: memref<1x128xf32, #tpu.memory_space<vmem>>, %arg5: memref<128x128xf32, #tpu.memory_space<vmem>>, %arg6: memref<1x128xf32, #tpu.memory_space<vmem>>, %arg7: memref<16x128xf32, #tpu.memory_space<vmem>>, %arg8: memref<16x128xf32, #tpu.memory_space<vmem>>) attributes {dimension_semantics = [#tpu.dimension_semantics<parallel>, #tpu.dimension_semantics<arbitrary>], iteration_bounds = array<i64: 1, 2>, scalar_prefetch = 0 : i64, scratch_operands = 1 : i64, tpu.core_type = #tpu.core_type<tc>, window_params = [{transform_indices = @transform_0, window_bounds = array<i64: 16, 512>}, {transform_indices = @transform_1, window_bounds = array<i64: 512, 128>}, {pipeline_mode = #tpu.pipeline_mode<synchronous>, transform_indices = @transform_2, window_bounds = array<i64: 1, 128>}, {pipeline_mode = #tpu.pipeline_mode<synchronous>, transform_indices = @transform_3, window_bounds = array<i64: 128, 128>}, {pipeline_mode = #tpu.pipeline_mode<synchronous>, transform_indices = @transform_4, window_bounds = array<i64: 1, 128>}, {transform_indices = @transform_5, window_bounds = array<i64: 16, 128>}]} {
    %c0_i32 = arith.constant 0 : i32
    %0 = arith.cmpi eq, %arg1, %c0_i32 : i32
    %1 = arith.extui %0 : i1 to i32
    %c0_i32_0 = arith.constant 0 : i32
    %2 = arith.cmpi ne, %1, %c0_i32_0 : i32
    scf.if %2 {
      %cst_9 = arith.constant 0.000000e+00 : f32
      %12 = vector.broadcast %cst_9 : f32 to vector<16x128xf32>
      %c0_10 = arith.constant 0 : index
      %c0_11 = arith.constant 0 : index
      %13 = vector.load %arg8[%c0_10, %c0_11] : memref<16x128xf32, #tpu.memory_space<vmem>>, vector<16x128xf32>
      tpu.vector_store %arg8[%c0_10, %c0_11], %12 {strides = array<i32>} : memref<16x128xf32, #tpu.memory_space<vmem>>, vector<16x128xf32>,
    } else {
    }
    %c0 = arith.constant 0 : index
    %c0_1 = arith.constant 0 : index
    %3 = vector.load %arg8[%c0, %c0_1] : memref<16x128xf32, #tpu.memory_space<vmem>>, vector<16x128xf32>
    %c0_2 = arith.constant 0 : index
    %c0_3 = arith.constant 0 : index
    %4 = vector.load %arg2[%c0_2, %c0_3] : memref<16x512xf32, #tpu.memory_space<vmem>>, vector<16x512xf32>
    %c0_4 = arith.constant 0 : index
    %c0_5 = arith.constant 0 : index
    %5 = vector.load %arg3[%c0_4, %c0_5] : memref<512x128xf32, #tpu.memory_space<vmem>>, vector<512x128xf32>
    %cst = arith.constant dense<0.000000e+00> : vector<16x128xf32>
    %6 = tpu.matmul %4, %5, %cst {dimension_numbers = #tpu.dot_dimension_numbers<[1], [0], [0], [1], [0, 0, 1, 1], [], []>} : vector<16x512xf32>, vector<512x128xf32>, vector<16x128xf32> -> vector<16x128xf32>
    %7 = arith.addf %3, %6 : vector<16x128xf32>
    %c0_6 = arith.constant 0 : index
    %c0_7 = arith.constant 0 : index
    %8 = vector.load %arg8[%c0_6, %c0_7] : memref<16x128xf32, #tpu.memory_space<vmem>>, vector<16x128xf32>
    tpu.vector_store %arg8[%c0_6, %c0_7], %7 {strides = array<i32>} : memref<16x128xf32, #tpu.memory_space<vmem>>, vector<16x128xf32>,
    %c1_i32 = arith.constant 1 : i32
    %9 = arith.cmpi eq, %arg1, %c1_i32 : i32
    %10 = arith.extui %9 : i1 to i32
    %c0_i32_8 = arith.constant 0 : i32
    %11 = arith.cmpi ne, %10, %c0_i32_8 : i32
    scf.if %11 {
      %c0_9 = arith.constant 0 : index
      %c0_10 = arith.constant 0 : index
      %12 = vector.load %arg8[%c0_9, %c0_10] : memref<16x128xf32, #tpu.memory_space<vmem>>, vector<16x128xf32>
      %c0_11 = arith.constant 0 : index
      %c0_12 = arith.constant 0 : index
      %13 = vector.load %arg4[%c0_11, %c0_12] : memref<1x128xf32, #tpu.memory_space<vmem>>, vector<1x128xf32>
      %14 = vector.broadcast %13 : vector<1x128xf32> to vector<16x128xf32>
      %15 = arith.addf %12, %14 : vector<16x128xf32>
      %c0_13 = arith.constant 0 : index
      %c0_14 = arith.constant 0 : index
      %16 = vector.load %arg5[%c0_13, %c0_14] : memref<128x128xf32, #tpu.memory_space<vmem>>, vector<128x128xf32>
      %cst_15 = arith.constant dense<0.000000e+00> : vector<16x128xf32>
      %17 = tpu.matmul %15, %16, %cst_15 {dimension_numbers = #tpu.dot_dimension_numbers<[1], [0], [0], [1], [0, 0, 1, 1], [], []>} : vector<16x128xf32>, vector<128x128xf32>, vector<16x128xf32> -> vector<16x128xf32>
      %c0_16 = arith.constant 0 : index
      %c0_17 = arith.constant 0 : index
      %18 = vector.load %arg6[%c0_16, %c0_17] : memref<1x128xf32, #tpu.memory_space<vmem>>, vector<1x128xf32>
      %19 = vector.broadcast %18 : vector<1x128xf32> to vector<16x128xf32>
      %20 = arith.addf %17, %19 : vector<16x128xf32>
      %c0_18 = arith.constant 0 : index
      %c0_19 = arith.constant 0 : index
      %21 = vector.load %arg7[%c0_18, %c0_19] : memref<16x128xf32, #tpu.memory_space<vmem>>, vector<16x128xf32>
      tpu.vector_store %arg7[%c0_18, %c0_19], %20 {strides = array<i32>} : memref<16x128xf32, #tpu.memory_space<vmem>>, vector<16x128xf32>,
    } else {
    }
    return
  }
  func.func @transform_0(%arg0: i32, %arg1: i32) -> (i32, i32) {
    %c0_i32 = arith.constant 0 : i32
    return %arg0, %arg1 : i32, i32
  }
  func.func @transform_1(%arg0: i32, %arg1: i32) -> (i32, i32) {
    %c0_i32 = arith.constant 0 : i32
    %c0_i32_0 = arith.constant 0 : i32
    return %arg1, %c0_i32 : i32, i32
  }
  func.func @transform_2(%arg0: i32, %arg1: i32) -> (i32, i32) {
    %c0_i32 = arith.constant 0 : i32
    %c0_i32_0 = arith.constant 0 : i32
    %c0_i32_1 = arith.constant 0 : i32
    return %c0_i32, %c0_i32_0 : i32, i32
  }
  func.func @transform_3(%arg0: i32, %arg1: i32) -> (i32, i32) {
    %c0_i32 = arith.constant 0 : i32
    %c0_i32_0 = arith.constant 0 : i32
    %c0_i32_1 = arith.constant 0 : i32
    return %c0_i32, %c0_i32_0 : i32, i32
  }
  func.func @transform_4(%arg0: i32, %arg1: i32) -> (i32, i32) {
    %c0_i32 = arith.constant 0 : i32
    %c0_i32_0 = arith.constant 0 : i32
    %c0_i32_1 = arith.constant 0 : i32
    return %c0_i32, %c0_i32_0 : i32, i32
  }
  func.func @transform_5(%arg0: i32, %arg1: i32) -> (i32, i32) {
    %c0_i32 = arith.constant 0 : i32
    %c0_i32_0 = arith.constant 0 : i32
    return %arg0, %c0_i32 : i32, i32
  }
}

</mosaic_0001>

<bundles_post_ra>
// kernel: tpu_custom_call.1
= control target key start
LH: loop header
LB: loop body
LE: loop exit
PB: predicated region body
PF: predicated region fallthrough
CT: control target
= control target key end

     0   :  { %s1461_s0 = inlined_call_operand.hbm [shape: f32[16,1024], index: 0, kind: input, shape index: {}]   ;;  %s1462_s1 = inlined_call_operand.hbm [shape: f32[1024,128], index: 1, kind: input, shape index: {}]   ;;  %s1463_s2 = inlined_call_operand.vmem [shape: f32[1,128], index: 2, kind: input, shape index: {}]   ;;  %s1464_s3 = inlined_call_operand.hbm [shape: f32[128,128], index: 3, kind: input, shape index: {}]   ;;  %s1465_s4 = inlined_call_operand.vmem [shape: f32[1,128], index: 4, kind: input, shape index: {}]   ;;  %s1466_s5 = inlined_call_operand.hbm [shape: f32[16,128], index: 5, kind: output, shape index: {}]  }
   0x1   :  { %1473 = sst [smem:[#allocation17_spill]] %s1461_s0 }
   0x2   :  { %1474 = sst [smem:[#allocation18_spill]] %s1464_s3 }
   0x3   :  { %10 = vsyncpa [#allocation4], 0 }
   0x4   :  { %12 = vsyncpa [#allocation4 + $0x1], 0 }
   0x5   :  { %13 = vsyncpa [#allocation7], 0 }
   0x6   :  { %15 = vsyncpa [#allocation7 + $0x1], 0 }
   0x7   :  { %16 = vsyncpa [#allocation5], 0  ;;  %s1219_s18 = smov 0   ;;  %s1221_s19 = smov 0  }
   0x8   :  { %s1223_s20 = smov 0   ;;  %s1225_s21 = smov 0  }
   0x9   :  { %s1227_s22 = smov 0   ;;  %s1229_s23 = smov 0  }
   0xa LB: > { %1475 = sst [smem:[#allocation14_spill]] %s1163_s20  ;;  %s1248_s24 = sadd.s32 4294967295, %s1175_s23   ;;  %s1175_s23 = sphi %s1229_s23, %s22_s23   ;;  %s1171_s22 = sphi %s1227_s22, %s1494_s22   ;;  %s1167_s21 = sphi %s1225_s21, %s1493_s21   ;;  %s1163_s20 = sphi %s1223_s20, %s1489_s20   ;;  %s1159_s19 = sphi %s1221_s19, %s1492_s19   ;;  %s1155_s18 = sphi %s1219_s18, %s1491_s18  }
   0xb   : > { %s43_s25 = sadd.s32 1, %s1163_s20  ;;  %p50_p0 = scmp.ne.s32.totalorder %s1163_s20, %s1159_s19 }
   0xc   : > { %p51_p1 = scmp.eq.s32.totalorder %s1175_s23, 0  ;;  %p56_p2 = scmp.ne.s32.totalorder %s1159_s19, %s1155_s18 }
   0xd   : > { %p57_p3 = scmp.eq.s32.totalorder %s1248_s24, 0  ;;  %p769_p5 = scmp.ge.s32.totalorder %s1175_s23, 1 }
   0xe   : > { %p52_p4 = por %p51_p1, %p50_p0  ;;  %p182_p7 = scmp.lt.s32.totalorder %s1175_s23, 3 }
   0xf   : > { %p1259_p6 = por %p57_p3, %p56_p2  ;;  %s1177_s28 = smov [#allocation8]  }
  0x10   : > { %p1264_p8 = pnand %p769_p5, %p182_p7  ;;  %s197_s29 = sshll.u32 %s1177_s28, 4  ;;  %s198_s29 = int_to_ptr.vmem [resolvable:$true] %s197_s29 }
  0x11   : > { %s1476_s26 = scalar_select %p1259_p6, 1, 0 }
  0x12   : > { %s1477_s27 = scalar_select %p1264_p8, 1, 0 }
  0x13   : > { %p933_p9 = pneg %p1264_p8  ;;  %p945_p10 = scmp.lt.s32.totalorder %s1175_s23, 2 }
  0x14   : > { %s31_s7 = sadd.s32 1, %s1171_s22  ;;  %s1018_s8 = scalar_lea.vmem %s198_s29, 2048 }
  0x15   : > { %p1273_p11 = pnand %p933_p9, %p57_p3  ;;  %p1277_p12 = pnand %p945_p10, %p52_p4 }
  0x16   : > { %p1019_p0 = scmp.ne.s32.totalorder %s198_s29, %s1018_s8  ;;  %p1026_p5 = scmp.lt.s32.totalorder %s198_s29, %s198_s29 }
  0x17   : > { %p1009_p13 = pneg %p1273_p11  ;;  %p1027_p7 = scmp.lt.s32.totalorder %s1018_s8, %s1018_s8 }
  0x19   : > { %p1021_p1 = pnand %p1019_p0, %p1009_p13  ;;  %p1028_p6 = por %p1027_p7, %p1026_p5 }
  0x1b   : > { %p1022_p2 = pneg %p1021_p1 }
  0x1d   : > { %p1029_p8 = pnand %p1028_p6, %p1022_p2 }
  0x1f   : > { %1032 = shalt.err (!%p1029_p8)
}
  0x20   : > { %s1469_s9 = smov 128   ;;  %s1470_s10 = smov 8  }
  0x21   : > { %s1480_s3 = sld [smem:[#allocation18_spill]]  ;;  %p32_p4 = scmp.ge.s32.totalorder %s31_s7, 2 }
  0x22   : > { %s1293_s13 = sand.u32 1, %s1163_s20   ;;  %s790_s14 = sshll.u32 %s1171_s22, 9 }
  0x23   : > { %s1496_s7 = smov (%p32_p4, %s31_s7), 0  ;;  %s772_s15 = sshll.u32 %s1293_s13, 6 }
  0x24   : > { %1481 = sst [smem:[#allocation15_spill]] %s1496_s7  ;;  %s39_s16 = ssub.s32 %s1171_s22, %s1496_s7 }
  0x25   : > { %p41_p6 = scmp.eq.s32.totalorder %s39_s16, 0  ;;  %s1482_s0 = sld [smem:[#allocation17_spill]] }
  0x26   : > { %s218_s30 = scalar_lea.vmem [#allocation3], %s772_s15  ;;  %s238_s11 = sand.u32 1, %s1175_s23  }
  0x27   : > { %936 = dma.hbm_to_vmem [thread:$0]  (!%p1273_p11), %s1480_s3, 2048, %s198_s29, [#allocation7], %s1469_s9, %s1469_s9, %s1470_s10  }
  0x28   : > { %s228_s8 = sshll.u32 %s218_s30, 4  ;;  %s215_s12 = scalar_lea.sflag [#allocation4], %s1293_s13  ;;  %s229_s8 = int_to_ptr.vmem [resolvable:$true] %s228_s8 }
  0x29   : > { %s1307_s29 = scalar_select %p41_p6, %s1163_s20, %s43_s25  }
  0x2a   : > { %p1035_p8 = pneg %p1277_p12  ;;  %s1046_s9 = scalar_lea.vmem %s229_s8, 1024 }
  0x2b   : > { %s227_s28 = scalar_lea.hbm %s1482_s0, %s790_s14  ;;  %1483 = sst [smem:[#allocation16_spill]] %s1307_s29 }
  0x2c   : > { %p1047_p9 = scmp.ne.s32.totalorder %s229_s8, %s1046_s9  ;;  %s1180_s16 = smov [#allocation3]  }
  0x2d   : > { %s1051_s10 = sshll.u32 %s1180_s16, 4  ;;  %s1052_s10 = int_to_ptr.vmem [resolvable:$false] %s1051_s10 }
  0x2e   : > { %p1049_p10 = pnand %p1047_p9, %p1035_p8  ;;  %s1053_s14 = scalar_lea.vmem %s1052_s10, 2048 }
  0x2f   : > { %p1054_p13 = scmp.lt.s32.totalorder %s229_s8, %s1052_s10  ;;  %p1055_p0 = scmp.lt.s32.totalorder %s1053_s14, %s1046_s9 }
  0x30   : > { %p1050_p11 = pneg %p1049_p10 }
  0x31   : > { %p1056_p1 = por %p1055_p0, %p1054_p13 }
  0x33   : > { %p1057_p2 = pnand %p1056_p1, %p1050_p11 }
  0x35   : > { %1060 = shalt.err (!%p1057_p2)
}
  0x36   : > { %s1181_s25 = smov 1024   ;;  %s1182_s15 = smov 512  }
  0x37   : > { %s1183_s17 = smov 32   ;;  %s775_s18 = sshll.u32 %s1293_s13, 9 }
  0x38   : > { %940 = dma.hbm_to_vmem [thread:$0]  (!%p1277_p12), %s227_s28, 1024, %s229_s8, %s215_s12, %s1181_s25, %s1182_s15, %s1183_s17  }
  0x39   : > { %s791_s30 = sshll.u32 %s1171_s22, 13  ;;  %s242_s10 = scalar_lea.vmem [#allocation6], %s775_s18 }
  0x3a   : > { %s248_s3 = scalar_lea.hbm %s1462_s1, %s791_s30  ;;  %s249_s9 = sshll.u32 %s242_s10, 4  ;;  %s250_s9 = int_to_ptr.vmem [resolvable:$true] %s249_s9 }
  0x3b   : > { %s239_s14 = scalar_lea.sflag [#allocation7], %s238_s11  ;;  %s1074_s7 = scalar_lea.vmem %s250_s9, 8192 }
  0x3c   : > { %p1075_p5 = scmp.ne.s32.totalorder %s250_s9, %s1074_s7  ;;  %s1184_s29 = smov [#allocation6]  }
  0x3d   : > { %s1079_s20 = sshll.u32 %s1184_s29, 4  ;;  %s1080_s20 = int_to_ptr.vmem [resolvable:$false] %s1079_s20 }
  0x3e   : > { %p1077_p7 = pnand %p1075_p5, %p1035_p8  ;;  %s1081_s28 = scalar_lea.vmem %s1080_s20, 16384 }
  0x3f   : > { %p1082_p6 = scmp.lt.s32.totalorder %s250_s9, %s1080_s20  ;;  %p1083_p9 = scmp.lt.s32.totalorder %s1081_s28, %s1074_s7 }
  0x40   : > { %p1078_p4 = pneg %p1077_p7 }
  0x41   : > { %p1084_p10 = por %p1083_p9, %p1082_p6 }
  0x43   : > { %p1085_p11 = pnand %p1084_p10, %p1078_p4 }
  0x45   : > { %1088 = shalt.err (!%p1085_p11)
}
  0x46   : > { %s1484_s0 = smov 8   ;;  %s1485_s13 = smov 128  }
  0x47   : > { %943 = dma.hbm_to_vmem [thread:$0]  (!%p1277_p12), %s248_s3, 8192, %s250_s9, %s239_s14, %s1485_s13, %s1485_s13, %s1484_s0  }
  0x48   : > { %p1486_p13 = scmp.ne.s32.totalorder %s1477_s27, 0 }
  0x49   : > { %s263_s8 = sand.u32 (!%p1486_p13), 1, %s1159_s19   ;;  %p1487_p8 = scmp.ne.s32.totalorder (!%p1486_p13), %s1476_s26, 0 }
  0x4a   : > { %261 = sbr.rel (%p1486_p13) target bundleno = 583 (0x247), region = 40  ;;  %s779_s29 = sshll.u32 (!%p1486_p13), %s263_s8, 6 }
  0x4b   : > { %s264_s11 = scalar_lea.sflag (!%p1486_p13), [#allocation4], %s263_s8  ;;  %s1334_s12 = scalar_lea.vmem (!%p1486_p13), [#allocation3], %s779_s29 }
  0x4f   : > { %1138 = dma.done.wait (%p1487_p8), %s264_s11, 1024  }
  0x50   : > { %1140 = vsyncadd (%p1487_p8), %s264_s11, 4294966272  ;;  %s272_s20 = sand.u32 1, %s1248_s24   ;;  %s780_s6 = sshll.u32 %s263_s8, 9 }
  0x51   : > { %s273_s3 = scalar_lea.sflag [#allocation7], %s272_s20  ;;  %s1341_s7 = scalar_lea.vmem [#allocation6], %s780_s6 }
  0x52   : > { %1142 = dma.done.wait (%p1487_p8), %s273_s3, 8192  }
  0x53   : > { %1144 = vsyncadd (%p1487_p8), %s273_s3, 4294959104 }
  0x54   : > { %1146 = dma.done.wait (%p57_p3), [#allocation7], 2048  }
  0x55   : > { %1148 = vsyncadd (%p57_p3), [#allocation7], 4294965248  ;;  %p782_p12 = scmp.ne.s32.totalorder %s1167_s21, 0 }
  0x57   : > { %314 = sbr.rel (%p782_p12) target bundleno = 94 (0x5e), region = 56 }
  0x5c   : > { %v1185_v0 = vmov 0.0  }
  0x5d   : > { %315 = vst [vmem:[#allocation2] sm:$0xff] %v1185_v0  ;;  %316 = vst [vmem:[#allocation2 + $0x8] sm:$0xff] %v1185_v0 }
  0x5e PF: > { %v358_v1 = vld [vmem:[%s1341_s7 + $0xf8] sm:$0xff]  ;;  %v357_v5 = vld [vmem:[%s1341_s7 + $0xf0] sm:$0xff]  ;;  %v356_v9 = vld [vmem:[%s1341_s7 + $0xe8] sm:$0xff]  ;;  %p783_p3 = scmp.ne.s32.totalorder %s1167_s21, 1 }
  0x5f   : > { %v390_v2 = vld [vmem:[%s1341_s7 + $0x1f8] sm:$0xff]  ;;  %792 = vmatprep.subr.mxu0 %v358_v1  ;;  %v389_v6 = vld [vmem:[%s1341_s7 + $0x1f0] sm:$0xff]  ;;  %v388_v10 = vld [vmem:[%s1341_s7 + $0x1e8] sm:$0xff] }
  0x60   : > { %v342_v3 = vld [vmem:[%s1341_s7 + $0x78] sm:$0xff]  ;;  %830 = vmatprep.subr.mxu1 %v390_v2  ;;  %v341_v7 = vld [vmem:[%s1341_s7 + $0x70] sm:$0xff]  ;;  %v340_v11 = vld [vmem:[%s1341_s7 + $0x68] sm:$0xff] }
  0x61   : > { %v374_v4 = vld [vmem:[%s1341_s7 + $0x178] sm:$0xff]  ;;  %793 = vmatpush3.msra.mxu0 %v342_v3  ;;  %v373_v8 = vld [vmem:[%s1341_s7 + $0x170] sm:$0xff]  ;;  %v372_v12 = vld [vmem:[%s1341_s7 + $0x168] sm:$0xff] }
  0x62   : > { %831 = vmatpush3.msra.mxu1 %v374_v4  ;;  %794 = vmatprep.subr.mxu0 %v357_v5  ;;  %v355_v13 = vld [vmem:[%s1341_s7 + $0xe0] sm:$0xff]  ;;  %v354_v17 = vld [vmem:[%s1341_s7 + $0xd8] sm:$0xff]  ;;  %v353_v21 = vld [vmem:[%s1341_s7 + $0xd0] sm:$0xff] }
  0x63   : > { %832 = vmatprep.subr.mxu1 %v389_v6  ;;  %795 = vmatpush3.msra.mxu0 %v341_v7  ;;  %v387_v14 = vld [vmem:[%s1341_s7 + $0x1e0] sm:$0xff]  ;;  %v386_v18 = vld [vmem:[%s1341_s7 + $0x1d8] sm:$0xff]  ;;  %v385_v22 = vld [vmem:[%s1341_s7 + $0x1d0] sm:$0xff] }
  0x64   : > { %833 = vmatpush3.msra.mxu1 %v373_v8  ;;  %796 = vmatprep.subr.mxu0 %v356_v9  ;;  %v339_v15 = vld [vmem:[%s1341_s7 + $0x60] sm:$0xff]  ;;  %v338_v19 = vld [vmem:[%s1341_s7 + $0x58] sm:$0xff]  ;;  %v337_v23 = vld [vmem:[%s1341_s7 + $0x50] sm:$0xff] }
  0x65   : > { %834 = vmatprep.subr.mxu1 %v388_v10  ;;  %v371_v16 = vld [vmem:[%s1341_s7 + $0x160] sm:$0xff]  ;;  %797 = vmatpush3.msra.mxu0 %v340_v11  ;;  %v370_v20 = vld [vmem:[%s1341_s7 + $0x158] sm:$0xff]  ;;  %v369_v24 = vld [vmem:[%s1341_s7 + $0x150] sm:$0xff] }
  0x66   : > { %835 = vmatpush3.msra.mxu1 %v372_v12  ;;  %798 = vmatprep.subr.mxu0 %v355_v13  ;;  %v352_v25 = vld [vmem:[%s1341_s7 + $0xc8] sm:$0xff]  ;;  %v351_v29 = vld [vmem:[%s1341_s7 + $0xc0] sm:$0xff]  ;;  %v350_v33 = vld [vmem:[%s1341_s7 + $0xb8] sm:$0xff] }
  0x67   : > { %836 = vmatprep.subr.mxu1 %v387_v14  ;;  %799 = vmatpush3.msra.mxu0 %v339_v15  ;;  %v384_v26 = vld [vmem:[%s1341_s7 + $0x1c8] sm:$0xff]  ;;  %v383_v30 = vld [vmem:[%s1341_s7 + $0x1c0] sm:$0xff]  ;;  %v382_v34 = vld [vmem:[%s1341_s7 + $0x1b8] sm:$0xff] }
  0x68   : > { %837 = vmatpush3.msra.mxu1 %v371_v16  ;;  %800 = vmatprep.subr.mxu0 %v354_v17  ;;  %v336_v27 = vld [vmem:[%s1341_s7 + $0x48] sm:$0xff]  ;;  %v335_v31 = vld [vmem:[%s1341_s7 + $0x40] sm:$0xff]  ;;  %v334_v35 = vld [vmem:[%s1341_s7 + $0x38] sm:$0xff] }
  0x69   : > { %838 = vmatprep.subr.mxu1 %v386_v18  ;;  %801 = vmatpush3.msra.mxu0 %v338_v19  ;;  %v368_v28 = vld [vmem:[%s1341_s7 + $0x148] sm:$0xff]  ;;  %v367_v32 = vld [vmem:[%s1341_s7 + $0x140] sm:$0xff]  ;;  %v366_v36 = vld [vmem:[%s1341_s7 + $0x138] sm:$0xff] }
  0x6a   : > { %839 = vmatpush3.msra.mxu1 %v370_v20  ;;  %802 = vmatprep.subr.mxu0 %v353_v21  ;;  %v349_v37 = vld [vmem:[%s1341_s7 + $0xb0] sm:$0xff]  ;;  %v348_v41 = vld [vmem:[%s1341_s7 + $0xa8] sm:$0xff]  ;;  %v347_v45 = vld [vmem:[%s1341_s7 + $0xa0] sm:$0xff] }
  0x6b   : > { %840 = vmatprep.subr.mxu1 %v385_v22  ;;  %803 = vmatpush3.msra.mxu0 %v337_v23  ;;  %v381_v38 = vld [vmem:[%s1341_s7 + $0x1b0] sm:$0xff]  ;;  %v380_v42 = vld [vmem:[%s1341_s7 + $0x1a8] sm:$0xff]  ;;  %v379_v46 = vld [vmem:[%s1341_s7 + $0x1a0] sm:$0xff] }
  0x6c   : > { %841 = vmatpush3.msra.mxu1 %v369_v24  ;;  %804 = vmatprep.subr.mxu0 %v352_v25  ;;  %v333_v39 = vld [vmem:[%s1341_s7 + $0x30] sm:$0xff]  ;;  %v332_v43 = vld [vmem:[%s1341_s7 + $0x28] sm:$0xff]  ;;  %v331_v47 = vld [vmem:[%s1341_s7 + $0x20] sm:$0xff] }
  0x6d   : > { %842 = vmatprep.subr.mxu1 %v384_v26  ;;  %805 = vmatpush3.msra.mxu0 %v336_v27  ;;  %v365_v40 = vld [vmem:[%s1341_s7 + $0x130] sm:$0xff]  ;;  %v364_v44 = vld [vmem:[%s1341_s7 + $0x128] sm:$0xff]  ;;  %v363_v48 = vld [vmem:[%s1341_s7 + $0x120] sm:$0xff] }
  0x6e   : > { %843 = vmatpush3.msra.mxu1 %v368_v28  ;;  %806 = vmatprep.subr.mxu0 %v351_v29  ;;  %v346_v49 = vld [vmem:[%s1341_s7 + $0x98] sm:$0xff]  ;;  %v345_v53 = vld [vmem:[%s1341_s7 + $0x90] sm:$0xff]  ;;  %v344_v57 = vld [vmem:[%s1341_s7 + $0x88] sm:$0xff] }
  0x6f   : > { %844 = vmatprep.subr.mxu1 %v383_v30  ;;  %807 = vmatpush3.msra.mxu0 %v335_v31  ;;  %v378_v50 = vld [vmem:[%s1341_s7 + $0x198] sm:$0xff]  ;;  %v377_v54 = vld [vmem:[%s1341_s7 + $0x190] sm:$0xff]  ;;  %v376_v58 = vld [vmem:[%s1341_s7 + $0x188] sm:$0xff] }
  0x70   : > { %845 = vmatpush3.msra.mxu1 %v367_v32  ;;  %808 = vmatprep.subr.mxu0 %v350_v33  ;;  %v330_v51 = vld [vmem:[%s1341_s7 + $0x18] sm:$0xff]  ;;  %v329_v55 = vld [vmem:[%s1341_s7 + $0x10] sm:$0xff]  ;;  %v328_v59 = vld [vmem:[%s1341_s7 + $0x8] sm:$0xff] }
  0x71   : > { %846 = vmatprep.subr.mxu1 %v382_v34  ;;  %809 = vmatpush3.msra.mxu0 %v334_v35  ;;  %v362_v52 = vld [vmem:[%s1341_s7 + $0x118] sm:$0xff]  ;;  %v361_v56 = vld [vmem:[%s1341_s7 + $0x110] sm:$0xff]  ;;  %v360_v60 = vld [vmem:[%s1341_s7 + $0x108] sm:$0xff] }
  0x72   : > { %847 = vmatpush3.msra.mxu1 %v366_v36  ;;  %810 = vmatprep.subr.mxu0 %v349_v37  ;;  %v343_v61 = vld [vmem:[%s1341_s7 + $0x80] sm:$0xff]  ;;  %v320_v0 = vld [vmem:[%s1334_s12 + $0x8] sm:$0xff]  ;;  %v322_v2 = vld [vmem:[%s1334_s12 + $0x18] sm:$0xff] }
  0x73   : > { %848 = vmatprep.subr.mxu1 %v381_v38  ;;  %811 = vmatpush3.msra.mxu0 %v333_v39  ;;  %v375_v62 = vld [vmem:[%s1341_s7 + $0x180] sm:$0xff]  ;;  %v321_v4 = vld [vmem:[%s1334_s12 + $0x10] sm:$0xff]  ;;  %v324_v5 = vld [vmem:[%s1334_s12 + $0x28] sm:$0xff] }
  0x74   : > { %849 = vmatpush3.msra.mxu1 %v365_v40  ;;  %812 = vmatprep.subr.mxu0 %v348_v41  ;;  %v327_v63 = vld [vmem:[%s1341_s7] sm:$0xff]  ;;  %v326_v6 = vld [vmem:[%s1334_s12 + $0x38] sm:$0xff]  ;;  %v325_v8 = vld [vmem:[%s1334_s12 + $0x30] sm:$0xff] }
  0x75   : > { %850 = vmatprep.subr.mxu1 %v380_v42  ;;  %813 = vmatpush3.msra.mxu0 %v332_v43  ;;  %v359_v1 = vld [vmem:[%s1341_s7 + $0x100] sm:$0xff]  ;;  %v317_v15 = vld [vmem:[#allocation2] sm:$0xff]  ;;  %v318_v24 = vld [vmem:[#allocation2 + $0x8] sm:$0xff] }
  0x76   : > { %851 = vmatpush3.msra.mxu1 %v364_v44  ;;  %814 = vmatprep.subr.mxu0 %v347_v45  ;;  %v319_v3 = vld [vmem:[%s1334_s12] sm:$0xff] }
  0x77   : > { %852 = vmatprep.subr.mxu1 %v379_v46  ;;  %815 = vmatpush3.msra.mxu0 %v331_v47  ;;  %v323_v7 = vld [vmem:[%s1334_s12 + $0x20] sm:$0xff] }
  0x78   : > { %853 = vmatpush3.msra.mxu1 %v363_v48  ;;  %816 = vmatprep.subr.mxu0 %v346_v49 }
  0x79   : > { %854 = vmatprep.subr.mxu1 %v378_v50  ;;  %817 = vmatpush3.msra.mxu0 %v330_v51 }
  0x7a   : > { %855 = vmatpush3.msra.mxu1 %v362_v52  ;;  %818 = vmatprep.subr.mxu0 %v345_v53 }
  0x7b   : > { %856 = vmatprep.subr.mxu1 %v377_v54  ;;  %819 = vmatpush3.msra.mxu0 %v329_v55 }
  0x7c   : > { %857 = vmatpush3.msra.mxu1 %v361_v56  ;;  %820 = vmatprep.subr.mxu0 %v344_v57 }
  0x7d   : > { %858 = vmatprep.subr.mxu1 %v376_v58  ;;  %821 = vmatpush3.msra.mxu0 %v328_v59 }
  0x7e   : > { %859 = vmatpush3.msra.mxu1 %v360_v60  ;;  %822 = vmatprep.subr.mxu0 %v343_v61 }
  0x7f   : > { %860 = vmatprep.subr.mxu1 %v375_v62  ;;  %823 = vmatpush3.msra.mxu0 %v327_v63 }
  0x80   : > { %455 = vmatprep.mubr.f32.mxu0 %v320_v0  ;;  %861 = vmatpush3.msra.mxu1 %v359_v1 }
  0x81   : > { %530 = vmatprep.mubr.f32.mxu1 %v322_v2  ;;  %456 = vmatmul.mubr.f32.vlgmr.msra.gmra.mxu0 %v319_v3 }
  0x82   : > { %531 = vmatmul.mubr.f32.vlgmr.msra.gmra.mxu1 %v321_v4  ;;  %460 = vmatprep.mubr.f32.mxu0 %v324_v5 }
  0x83   : > { %535 = vmatprep.mubr.f32.mxu1 %v326_v6 }
  0x85   : > { %461 = vmatmul.mubr.f32.gmra.mxu0 %v323_v7 }
  0x86   : > { %536 = vmatmul.mubr.f32.gmra.mxu1 %v325_v8 }
 0x141   : > { %v824_v9 = vpop.f32.mrf.mxu0 }
 0x142   : > { %v862_v10 = vpop.f32.mrf.mxu1 }
 0x143   : > { %v825_v11 = vpop.f32.mrf.mxu0 }
 0x144   : > { %v863_v12 = vpop.f32.mrf.mxu1  ;;  %v826_v13 = vadd.f32 %v825_v11, %v824_v9 }
 0x145   : > { %v864_v14 = vadd.f32 %v863_v12, %v862_v10  ;;  %v827_v16 = vpop.f32.mrf.mxu0 }
 0x146   : > { %v865_v17 = vpop.f32.mrf.mxu1 }
 0x147   : > { %v533_v18 = vadd.f32 %v864_v14, %v826_v13  ;;  %v828_v19 = vpop.f32.mrf.mxu0 }
 0x148   : > { %v866_v20 = vpop.f32.mrf.mxu1  ;;  %v829_v22 = vadd.f32 %v828_v19, %v827_v16 }
 0x149   : > { %v541_v21 = vadd.f32 %v533_v18, %v317_v15  ;;  %v867_v23 = vadd.f32 %v866_v20, %v865_v17 }
 0x14b   : > { %543 = vst [vmem:[#allocation2] sm:$0xff] %v541_v21  ;;  %v538_v25 = vadd.f32 %v867_v23, %v829_v22  ;;  %548 = sbr.rel (%p783_p3) target bundleno = 567 (0x237), region = 60 }
 0x14d   : > { %v542_v26 = vadd.f32 %v538_v25, %v318_v24 }
 0x14f   : > { %544 = vst [vmem:[#allocation2 + $0x8] sm:$0xff] %v542_v26 }
 0x150   : > { %v575_v27 = vld [vmem:[#allocation8 + $0x78] sm:$0xff]  ;;  %v574_v28 = vld [vmem:[#allocation8 + $0x70] sm:$0xff]  ;;  %v573_v29 = vld [vmem:[#allocation8 + $0x68] sm:$0xff] }
 0x151   : > { %886 = vmatprep.subr.mxu0 %v575_v27  ;;  %v572_v30 = vld [vmem:[#allocation8 + $0x60] sm:$0xff]  ;;  %v571_v32 = vld [vmem:[#allocation8 + $0x58] sm:$0xff]  ;;  %v784_v33 = vld [vmem:[%s1463_s2] ss:$0 sm:$0xff] }
 0x152   : > { %887 = vmatpush3.msra.mxu0 %v575_v27  ;;  %v549_v31 = vld [vmem:[#allocation2] sm:$0xff]  ;;  %v569_v36 = vld [vmem:[#allocation8 + $0x48] sm:$0xff]  ;;  %v568_v37 = vld [vmem:[#allocation8 + $0x40] sm:$0xff] }
 0x153   : > { %888 = vmatprep.subr.mxu0 %v574_v28  ;;  %v558_v34 = vadd.f32 %v784_v33, %v549_v31  ;;  %v570_v35 = vld [vmem:[#allocation8 + $0x50] sm:$0xff]  ;;  %v567_v38 = vld [vmem:[#allocation8 + $0x38] sm:$0xff]  ;;  %v565_v40 = vld [vmem:[#allocation8 + $0x28] sm:$0xff] }
 0x154   : > { %889 = vmatpush3.msra.mxu0 %v574_v28  ;;  %v566_v39 = vld [vmem:[#allocation8 + $0x30] sm:$0xff]  ;;  %v564_v41 = vld [vmem:[#allocation8 + $0x20] sm:$0xff]  ;;  %v563_v42 = vld [vmem:[#allocation8 + $0x18] sm:$0xff] }
 0x155   : > { %890 = vmatprep.subr.mxu0 %v573_v29  ;;  %918 = vmatprep.mubr.f32.mxu0 %v558_v34  ;;  %v562_v43 = vld [vmem:[#allocation8 + $0x10] sm:$0xff]  ;;  %v561_v44 = vld [vmem:[#allocation8 + $0x8] sm:$0xff]  ;;  %v560_v46 = vld [vmem:[#allocation8] sm:$0xff] }
 0x156   : > { %891 = vmatpush3.msra.mxu0 %v573_v29  ;;  %v550_v45 = vld [vmem:[#allocation2 + $0x8] sm:$0xff]  ;;  %v785_v48 = vld [vmem:[%s1465_s4] ss:$0 sm:$0xff] }
 0x157   : > { %892 = vmatprep.subr.mxu0 %v572_v30  ;;  %v559_v47 = vadd.f32 %v784_v33, %v550_v45 }
 0x158   : > { %893 = vmatpush3.msra.mxu0 %v572_v30 }
 0x159   : > { %894 = vmatprep.subr.mxu0 %v571_v32 }
 0x15a   : > { %895 = vmatpush3.msra.mxu0 %v571_v32 }
 0x15b   : > { %896 = vmatprep.subr.mxu0 %v570_v35 }
 0x15c   : > { %897 = vmatpush3.msra.mxu0 %v570_v35 }
 0x15d   : > { %898 = vmatprep.subr.mxu0 %v569_v36 }
 0x15e   : > { %899 = vmatpush3.msra.mxu0 %v569_v36 }
 0x15f   : > { %900 = vmatprep.subr.mxu0 %v568_v37 }
 0x160   : > { %901 = vmatpush3.msra.mxu0 %v568_v37 }
 0x161   : > { %902 = vmatprep.subr.mxu0 %v567_v38 }
 0x162   : > { %903 = vmatpush3.msra.mxu0 %v567_v38 }
 0x163   : > { %904 = vmatprep.subr.mxu0 %v566_v39 }
 0x164   : > { %905 = vmatpush3.msra.mxu0 %v566_v39 }
 0x165   : > { %906 = vmatprep.subr.mxu0 %v565_v40 }
 0x166   : > { %907 = vmatpush3.msra.mxu0 %v565_v40 }
 0x167   : > { %908 = vmatprep.subr.mxu0 %v564_v41 }
 0x168   : > { %909 = vmatpush3.msra.mxu0 %v564_v41 }
 0x169   : > { %910 = vmatprep.subr.mxu0 %v563_v42 }
 0x16a   : > { %911 = vmatpush3.msra.mxu0 %v563_v42 }
 0x16b   : > { %912 = vmatprep.subr.mxu0 %v562_v43 }
 0x16c   : > { %913 = vmatpush3.msra.mxu0 %v562_v43 }
 0x16d   : > { %914 = vmatprep.subr.mxu0 %v561_v44 }
 0x16e   : > { %915 = vmatpush3.msra.mxu0 %v561_v44 }
 0x16f   : > { %916 = vmatprep.subr.mxu0 %v560_v46 }
 0x170   : > { %917 = vmatpush3.msra.mxu0 %v560_v46 }
 0x171   : > { %919 = vmatmul.mubr.f32.vlgmr.msra.gmra.mxu0 %v559_v47 }
 0x231   : > { %v920_v49 = vpop.f32.mrf.mxu0 }
 0x232   : > { %v655_v50 = vadd.f32 %v920_v49, %v785_v48 }
 0x233   : > { %v649_v51 = vpop.f32.mrf.mxu0 }
 0x234   : > { %659 = vst [vmem:[#allocation9 + $0x8] sm:$0xff] %v655_v50  ;;  %v650_v52 = vadd.f32 %v785_v48, %v649_v51 }
 0x236   : > { %658 = vst [vmem:[#allocation9] sm:$0xff] %v650_v52 }
 0x237 PF: > { %p947_p0 = scmp.eq.s32.totalorder %s1248_s24, 1  ;;  %s1186_s15 = smov [#allocation9]  }
 0x238   : > { %s669_s17 = sshll.u32 %s1186_s15, 4  ;;  %s670_s17 = int_to_ptr.vmem [resolvable:$true] %s669_s17 }
 0x239   : > { %s1089_s18 = scalar_lea.vmem %s670_s17, 256  ;;  %p1096_p7 = scmp.lt.s32.totalorder %s670_s17, %s670_s17 }
 0x23a   : > { %p1090_p1 = scmp.ne.s32.totalorder %s670_s17, %s1089_s18  ;;  %p1097_p4 = scmp.lt.s32.totalorder %s1089_s18, %s1089_s18 }
 0x23c   : > { %p1091_p2 = pnand %p1090_p1, %p947_p0  ;;  %p1098_p6 = por %p1097_p4, %p1096_p7 }
 0x23e   : > { %p1092_p5 = pneg %p1091_p2 }
 0x240   : > { %p1099_p9 = pnand %p1098_p6, %p1092_p5 }
 0x242   : > { %1102 = shalt.err (!%p1099_p9)
}
 0x243   : > { %s1187_s30 = smov 128   ;;  %s1188_s16 = smov 8  }
 0x244   : > { %930 = dma.vmem_to_hbm [thread:$0]  (%p947_p0), %s670_s17, 256, %s1466_s5, [#allocation5], %s1187_s30, %s1187_s30, %s1188_s16  }
 0x245   : > { %1150 = dma.done.wait (%p947_p0), [#allocation5], 256  }
 0x246   : > { %1152 = vsyncadd (%p947_p0), [#allocation5], 4294967040 }
 0x247 PF: > { %s22_s23 = sadd.s32 1, %s1175_s23   ;;  %s1488_s14 = sld [smem:[#allocation14_spill]] }
 0x248   : > { %p19_p10 = scmp.ge.s32.totalorder %s22_s23, 4   ;;  %s1489_s20 = sld [smem:[#allocation16_spill]] }
 0x249   : > { %s1490_s28 = sld [smem:[#allocation15_spill]]  ;;  %s1491_s18 = smov %s1159_s19 }
 0x24a   : > { %s1493_s21 = smov %s1171_s22 }
 0x24b   :  { %21 = sbr.rel (!%p19_p10) target bundleno = 10 (0xa), region = 103 }
 0x24d   : > { %s1492_s19 = smov %s1488_s14 }
 0x24f   : > { %s1494_s22 = smov %s1490_s28 }
 0x250   :  { %685 = vsyncpa [#allocation4], 1 }
 0x251   :  { %687 = vsyncpa [#allocation4 + $0x1], 1 }
 0x252   :  { %688 = vsyncpa [#allocation7], 1 }
 0x253   :  { %690 = vsyncpa [#allocation7 + $0x1], 1 }
 0x254   :  { %691 = vsyncpa [#allocation5], 1 }
 0x255   :  { %693 = vsyncpa [#allocation5 + $0x1], 1 }

</bundles_post_ra>
